<compile_context>
chip_gen: v7x
topology: tpu7x:2x2x1
jax: 0.10.0
libtpu: 0.0.40
codegen_flags: <defaults>
</compile_context>

<pallas_src>
import jax
import jax.numpy as jnp
from jax.experimental import pallas as pl
from jax.experimental.pallas import tpu as pltpu

BN_EPS = 1e-5


# ---------------------------------------------------------------------------
# helpers
# ---------------------------------------------------------------------------
def _round_up(x, m):
    return -(-x // m) * m


def _vmem_budget():
    """Generation-aware sizing: (per-buffer seq-tile budget, scoped vmem limit)."""
    cap = 128 * 1024 * 1024
    try:
        cap = int(getattr(pltpu.get_tpu_info(), "vmem_capacity_bytes", cap))
    except Exception:
        pass
    if cap >= 96 * 1024 * 1024:                     # v5e / v6e class: 128 MiB physical
        return 12 * 1024 * 1024, 80 * 1024 * 1024
    return 6 * 1024 * 1024, 48 * 1024 * 1024        # v7x class: 64 MiB physical per TC


def _choose_batch_blk(bs, h, itemsize):
    """Tile the batch axis when possible.

    The x block's last dim is always the full h, so the (8,128) rule only constrains
    b_blk: a multiple of 8 for 4-byte inputs, 16 for 2-byte inputs (or the full batch).
    Keep each per-seq-row DMA segment (b_blk * h * itemsize) >= ~4 KiB so strided
    transfers don't become descriptor-bound.
    """
    sub = 16 if itemsize < 4 else 8
    if bs % sub != 0:
        return bs
    for cand in (256, 128, 64, 32, 16, 8):
        if cand % sub == 0 and cand < bs and bs % cand == 0 and cand * h * itemsize >= 4096:
            return cand
    return bs


def _choose_seq_blk(sl, b_blk, h, itemsize, budget_bytes):
    per_row = max(1, b_blk * h * itemsize)
    return int(max(1, min(sl, budget_bytes // per_row, 2048)))


def _fold_bn(p):
    """Fold inference-mode BatchNorm1d into the following Linear, in f32 (exact)."""
    w = p["w"].astype(jnp.float32)
    b = p["b"].astype(jnp.float32)
    gamma = p["gamma"].astype(jnp.float32)
    beta = p["beta"].astype(jnp.float32)
    mean = p["mean"].astype(jnp.float32)
    var = p["var"].astype(jnp.float32)
    scale = gamma * jax.lax.rsqrt(var + BN_EPS)                 # (1, ni)
    shift = beta - mean * scale                                 # (1, ni)
    return w * scale.reshape(-1, 1), b + shift @ w              # (ni, nf), (1, nf)


# ---------------------------------------------------------------------------
# fused kernel: streamed pooling + (BN-folded) MLP head
# ---------------------------------------------------------------------------
def _make_fused_kernel(sl, seq_blk, n_layers):
    n_s = -(-sl // seq_blk)
    rem = sl - (n_s - 1) * seq_blk              # valid rows in the final seq block
    last_loc = (sl - 1) - (n_s - 1) * seq_blk   # local index of x[-1] in that block
    inv_sl = 1.0 / float(sl)
    n_w = 4 + 2 * (n_layers - 1)                # w0_last, w0_max, w0_avg, b0, (w_i, b_i)...

    def kernel(x_ref, *refs):
        w_refs = refs[:n_w]
        out_ref = refs[n_w]
        max_acc = refs[n_w + 1]
        sum_acc = refs[n_w + 2]

        s = pl.program_id(1)                    # seq (reduction) axis, innermost

        @pl.when(s == 0)
        def _():
            max_acc[...] = jnp.full(max_acc.shape, -jnp.inf, jnp.float32)
            sum_acc[...] = jnp.zeros(sum_acc.shape, jnp.float32)

        xv = x_ref[...]                         # (seq_blk, b_blk, h), INPUT dtype

        def _accumulate(xs):
            # max in the input dtype (exact), cast only the (b_blk, h) result;
            # sum as an f32-typed reduce into the resident f32 accumulator.
            max_acc[...] = jnp.maximum(max_acc[...],
                                       jnp.max(xs, axis=0).astype(jnp.float32))
            sum_acc[...] = sum_acc[...] + jnp.sum(xs, axis=0, dtype=jnp.float32)

        if rem == seq_blk:                      # sl divisible by seq_blk: single path
            _accumulate(xv)
        else:                                   # guard the padded rows of the last block
            @pl.when(s < n_s - 1)
            def _():
                _accumulate(xv)

            @pl.when(s == n_s - 1)
            def _():
                _accumulate(xv[:rem])

        # Epilogue: whole MLP head, only on the final seq step of each batch tile.
        @pl.when(s == n_s - 1)
        def _():
            w0l, w0m, w0a, b0 = w_refs[0], w_refs[1], w_refs[2], w_refs[3]
            mm_dtype = w0l.dtype                # bf16 weights -> bf16 MXU operands
            last = x_ref[last_loc]              # x[-1]             -> (b_blk, h)
            mx = max_acc[...]                   # adaptive_max_pool -> (b_blk, h) f32
            avg = sum_acc[...] * inv_sl         # adaptive_avg_pool -> (b_blk, h) f32
            # Layer 0: cat([last, max, avg]) @ W0 == three per-slab MXU accumulations.
            y = (jnp.dot(last.astype(mm_dtype), w0l[...],
                         preferred_element_type=jnp.float32)
                 + jnp.dot(mx.astype(mm_dtype), w0m[...],
                           preferred_element_type=jnp.float32)
                 + jnp.dot(avg.astype(mm_dtype), w0a[...],
                           preferred_element_type=jnp.float32)
                 + b0[...].astype(jnp.float32))
            # Remaining LinearBlocks: relu(prev l_x) -> (BN-folded) Linear.
            for li in range(1, n_layers):
                feat = jnp.maximum(y, 0.0)
                w = w_refs[4 + 2 * (li - 1)]
                b = w_refs[5 + 2 * (li - 1)]
                y = (jnp.dot(feat.astype(w.dtype), w[...],
                             preferred_element_type=jnp.float32)
                     + b[...].astype(jnp.float32))
            out_ref[...] = y.astype(out_ref.dtype)   # pre-relu l_x of the last block

    return kernel


def _fused_forward(x, params):
    sl, bs, h = x.shape
    n_layers = len(params)
    nf_last = params[-1]["w"].shape[1]
    wdt = params[0]["w"].dtype                          # MXU compute dtype for weights

    # Fold BN (f32), pad EVERY layer width to a lane-dense multiple of 128 (exact),
    # then cast weights back to the supplied weight dtype; biases stay f32.
    folded = [_fold_bn(p) for p in params]
    nf_pads = [_round_up(w.shape[1], 128) for w, _ in folded]
    padded = []
    for li, (w, b) in enumerate(folded):
        ni, nf = w.shape
        row_pad = (nf_pads[li - 1] - ni) if li > 0 else 0
        col_pad = nf_pads[li] - nf
        padded.append((jnp.pad(w, ((0, row_pad), (0, col_pad))).astype(wdt),
                       jnp.pad(b, ((0, 0), (0, col_pad)))))     # bias stays f32
    nf_pad_last = nf_pads[-1]

    w0, b0 = padded[0]                                   # (3h, nf_pad0)
    w0l, w0m, w0a = w0[:h], w0[h:2 * h], w0[2 * h:]
    weight_args = [w0l, w0m, w0a, b0]
    for w, b in padded[1:]:
        weight_args += [w, b]

    tile_budget, vmem_limit = _vmem_budget()
    b_blk = _choose_batch_blk(bs, h, x.dtype.itemsize)
    seq_blk = _choose_seq_blk(sl, b_blk, h, x.dtype.itemsize, tile_budget)
    n_b = bs // b_blk
    n_s = -(-sl // seq_blk)

    kernel = _make_fused_kernel(sl, seq_blk, n_layers)

    in_specs = [pl.BlockSpec((seq_blk, b_blk, h), lambda b, s: (s, b, 0))]
    for _w in weight_args:                               # weights: one full-array block
        in_specs.append(pl.BlockSpec(_w.shape, lambda b, s: (0, 0)))

    out = pl.pallas_call(
        kernel,
        out_shape=jax.ShapeDtypeStruct((bs, nf_pad_last), jnp.float32),
        grid=(n_b, n_s),
        in_specs=in_specs,
        out_specs=pl.BlockSpec((b_blk, nf_pad_last), lambda b, s: (b, 0)),
        scratch_shapes=[pltpu.VMEM((b_blk, h), jnp.float32),    # running max
                        pltpu.VMEM((b_blk, h), jnp.float32)],   # running sum
        compiler_params=pltpu.CompilerParams(
            dimension_semantics=("parallel", "arbitrary"),
            vmem_limit_bytes=vmem_limit),
    )(x, *weight_args)
    return out[:, :nf_last]


@jax.jit
def pooling_linear_classifier(x, params):
    l_x = _fused_forward(x, params)
    return l_x, x                                        # (last pre-relu logits, raw input)


# ---------------------------------------------------------------------------
# parameter init (matches the module __init__ shapes, inference-mode BN state)
# ---------------------------------------------------------------------------
def init_params(key, layer_sizes):
    params = []
    for i in range(len(layer_sizes) - 1):
        ni, nf = layer_sizes[i], layer_sizes[i + 1]
        key, kw, kb = jax.random.split(key, 3)
        bound = 1.0 / jnp.sqrt(ni)
        params.append({
            # Linear weight stored transposed: (ni, nf)
            "w": jax.random.uniform(kw, (ni, nf), jnp.float32, -bound, bound),
            "b": jax.random.uniform(kb, (1, nf), jnp.float32, -bound, bound),
            # BatchNorm1d default init / running stats
            "gamma": jnp.ones((1, ni), jnp.float32),
            "beta": jnp.zeros((1, ni), jnp.float32),
            "mean": jnp.zeros((1, ni), jnp.float32),
            "var": jnp.ones((1, ni), jnp.float32),
        })
    return params


# ---------------------------------------------------------------------------
# pure-JAX reference (unfolded BN) for a numerical sanity check
# ---------------------------------------------------------------------------
def reference(x, params):
    last = x[-1]
    mx = jnp.max(x, axis=0)
    avg = jnp.mean(x, axis=0)
    feat = jnp.concatenate([last, mx, avg], axis=1)
    l_x = feat
    for p in params:
        xn = (feat - p["mean"]) / jnp.sqrt(p["var"] + BN_EPS) * p["gamma"] + p["beta"]
        l_x = xn @ p["w"] + p["b"]
        feat = jnp.maximum(l_x, 0.0)
    return l_x, x


if __name__ == "__main__":
    key = jax.random.PRNGKey(0)
    kx, kp, kx2, kp2 = jax.random.split(key, 4)

    # --- small config matching the module shapes (f32, tight check) --------
    seq_len, batch, hidden = 8, 2, 32
    layers = [3 * hidden, 64, 8]          # [96, 64, 8]
    x = jax.random.normal(kx, (seq_len, batch, hidden), jnp.float32)
    params = init_params(kp, layers)

    l_x, out = pooling_linear_classifier(x, params)
    jax.block_until_ready((l_x, out))
    ref_lx, ref_out = reference(x, params)
    assert l_x.shape == (batch, layers[-1]) and l_x.dtype == jnp.float32
    assert out.shape == x.shape
    assert jnp.allclose(l_x, ref_lx, rtol=1e-4, atol=1e-5)
    assert jnp.allclose(out, ref_out)

    # --- config exercising batch tiling + intermediate-width padding -------
    sl2, bs2, h2 = 16, 16, 256
    layers2 = [3 * h2, 50, 3]
    x2 = jax.random.normal(kx2, (sl2, bs2, h2), jnp.float32)
    params2 = init_params(kp2, layers2)
    l_x2, _ = pooling_linear_classifier(x2, params2)
    jax.block_until_ready(l_x2)
    ref_lx2, _ = reference(x2, params2)
    assert l_x2.shape == (bs2, layers2[-1])
    assert jnp.allclose(l_x2, ref_lx2, rtol=1e-4, atol=1e-4)

    # --- bf16 streaming path (bf16 activations + bf16 folded weights) ------
    x_bf = x.astype(jnp.bfloat16)
    params_bf = jax.tree_util.tree_map(lambda a: a.astype(jnp.bfloat16), params)
    l_x_bf, out_bf = pooling_linear_classifier(x_bf, params_bf)
    jax.block_until_ready((l_x_bf, out_bf))
    ref_bf, _ = reference(x_bf.astype(jnp.float32),
                          jax.tree_util.tree_map(lambda a: a.astype(jnp.float32), params_bf))
    assert l_x_bf.dtype == jnp.float32 and out_bf.dtype == jnp.bfloat16
    assert jnp.allclose(l_x_bf, ref_bf, rtol=5e-2, atol=5e-2)

    print("KERNEL_OK")
</pallas_src>

<mosaic_0001>
module attributes {stable_mosaic.version = 11 : i64} {
  func.func @kernel(%arg0: i32, %arg1: i32, %arg2: memref<8x2x32xf32, #tpu.memory_space<vmem>>, %arg3: memref<32x128xf32, #tpu.memory_space<vmem>>, %arg4: memref<32x128xf32, #tpu.memory_space<vmem>>, %arg5: memref<32x128xf32, #tpu.memory_space<vmem>>, %arg6: memref<1x128xf32, #tpu.memory_space<vmem>>, %arg7: memref<128x128xf32, #tpu.memory_space<vmem>>, %arg8: memref<1x128xf32, #tpu.memory_space<vmem>>, %arg9: memref<2x128xf32, #tpu.memory_space<vmem>>, %arg10: memref<2x32xf32, #tpu.memory_space<vmem>>, %arg11: memref<2x32xf32, #tpu.memory_space<vmem>>) attributes {dimension_semantics = [#tpu.dimension_semantics<parallel>, #tpu.dimension_semantics<arbitrary>], iteration_bounds = array<i64: 1, 1>, scalar_prefetch = 0 : i64, scratch_operands = 2 : i64, tpu.core_type = #tpu.core_type<tc>, window_params = [{transform_indices = @transform_0, window_bounds = array<i64: 8, 2, 32>}, {pipeline_mode = #tpu.pipeline_mode<synchronous>, transform_indices = @transform_1, window_bounds = array<i64: 32, 128>}, {pipeline_mode = #tpu.pipeline_mode<synchronous>, transform_indices = @transform_2, window_bounds = array<i64: 32, 128>}, {pipeline_mode = #tpu.pipeline_mode<synchronous>, transform_indices = @transform_3, window_bounds = array<i64: 32, 128>}, {pipeline_mode = #tpu.pipeline_mode<synchronous>, transform_indices = @transform_4, window_bounds = array<i64: 1, 128>}, {pipeline_mode = #tpu.pipeline_mode<synchronous>, transform_indices = @transform_5, window_bounds = array<i64: 128, 128>}, {pipeline_mode = #tpu.pipeline_mode<synchronous>, transform_indices = @transform_6, window_bounds = array<i64: 1, 128>}, {transform_indices = @transform_7, window_bounds = array<i64: 2, 128>}]} {
    %c0_i32 = arith.constant 0 : i32
    %0 = arith.cmpi eq, %arg1, %c0_i32 : i32
    %1 = arith.extui %0 : i1 to i32
    %c0_i32_0 = arith.constant 0 : i32
    %2 = arith.cmpi ne, %1, %c0_i32_0 : i32
    scf.if %2 {
      %cst_14 = arith.constant 0xFF800000 : f32
      %15 = vector.broadcast %cst_14 : f32 to vector<2x32xf32>
      %c0_15 = arith.constant 0 : index
      %c0_16 = arith.constant 0 : index
      %16 = vector.load %arg10[%c0_15, %c0_16] : memref<2x32xf32, #tpu.memory_space<vmem>>, vector<2x32xf32>
      tpu.vector_store %arg10[%c0_15, %c0_16], %15 {strides = array<i32>} : memref<2x32xf32, #tpu.memory_space<vmem>>, vector<2x32xf32>,
      %cst_17 = arith.constant 0.000000e+00 : f32
      %17 = vector.broadcast %cst_17 : f32 to vector<2x32xf32>
      %c0_18 = arith.constant 0 : index
      %c0_19 = arith.constant 0 : index
      %18 = vector.load %arg11[%c0_18, %c0_19] : memref<2x32xf32, #tpu.memory_space<vmem>>, vector<2x32xf32>
      tpu.vector_store %arg11[%c0_18, %c0_19], %17 {strides = array<i32>} : memref<2x32xf32, #tpu.memory_space<vmem>>, vector<2x32xf32>,
    } else {
    }
    %c0 = arith.constant 0 : index
    %c0_1 = arith.constant 0 : index
    %c0_2 = arith.constant 0 : index
    %3 = vector.load %arg2[%c0, %c0_1, %c0_2] : memref<8x2x32xf32, #tpu.memory_space<vmem>>, vector<8x2x32xf32>
    %c0_3 = arith.constant 0 : index
    %c0_4 = arith.constant 0 : index
    %4 = vector.load %arg10[%c0_3, %c0_4] : memref<2x32xf32, #tpu.memory_space<vmem>>, vector<2x32xf32>
    %cst = arith.constant dense<0xFF800000> : vector<2x32xf32>
    %5 = vector.multi_reduction <maximumf>, %3, %cst [0] : vector<8x2x32xf32> to vector<2x32xf32>
    %6 = arith.maximumf %4, %5 : vector<2x32xf32>
    %c0_5 = arith.constant 0 : index
    %c0_6 = arith.constant 0 : index
    %7 = vector.load %arg10[%c0_5, %c0_6] : memref<2x32xf32, #tpu.memory_space<vmem>>, vector<2x32xf32>
    tpu.vector_store %arg10[%c0_5, %c0_6], %6 {strides = array<i32>} : memref<2x32xf32, #tpu.memory_space<vmem>>, vector<2x32xf32>,
    %c0_7 = arith.constant 0 : index
    %c0_8 = arith.constant 0 : index
    %8 = vector.load %arg11[%c0_7, %c0_8] : memref<2x32xf32, #tpu.memory_space<vmem>>, vector<2x32xf32>
    %cst_9 = arith.constant dense<0.000000e+00> : vector<2x32xf32>
    %9 = vector.multi_reduction <add>, %3, %cst_9 [0] : vector<8x2x32xf32> to vector<2x32xf32>
    %10 = arith.addf %8, %9 : vector<2x32xf32>
    %c0_10 = arith.constant 0 : index
    %c0_11 = arith.constant 0 : index
    %11 = vector.load %arg11[%c0_10, %c0_11] : memref<2x32xf32, #tpu.memory_space<vmem>>, vector<2x32xf32>
    tpu.vector_store %arg11[%c0_10, %c0_11], %10 {strides = array<i32>} : memref<2x32xf32, #tpu.memory_space<vmem>>, vector<2x32xf32>,
    %c0_i32_12 = arith.constant 0 : i32
    %12 = arith.cmpi eq, %arg1, %c0_i32_12 : i32
    %13 = arith.extui %12 : i1 to i32
    %c0_i32_13 = arith.constant 0 : i32
    %14 = arith.cmpi ne, %13, %c0_i32_13 : i32
    scf.if %14 {
      %c7 = arith.constant 7 : index
      %c0_14 = arith.constant 0 : index
      %c0_15 = arith.constant 0 : index
      %15 = vector.load %arg2[%c7, %c0_14, %c0_15] : memref<8x2x32xf32, #tpu.memory_space<vmem>>, vector<1x2x32xf32>
      %16 = vector.shape_cast %15 : vector<1x2x32xf32> to vector<2x32xf32>
      %c0_16 = arith.constant 0 : index
      %c0_17 = arith.constant 0 : index
      %17 = vector.load %arg10[%c0_16, %c0_17] : memref<2x32xf32, #tpu.memory_space<vmem>>, vector<2x32xf32>
      %c0_18 = arith.constant 0 : index
      %c0_19 = arith.constant 0 : index
      %18 = vector.load %arg11[%c0_18, %c0_19] : memref<2x32xf32, #tpu.memory_space<vmem>>, vector<2x32xf32>
      %cst_20 = arith.constant 1.250000e-01 : f32
      %19 = vector.broadcast %cst_20 : f32 to vector<2x32xf32>
      %20 = arith.mulf %18, %19 : vector<2x32xf32>
      %c0_21 = arith.constant 0 : index
      %c0_22 = arith.constant 0 : index
      %21 = vector.load %arg3[%c0_21, %c0_22] : memref<32x128xf32, #tpu.memory_space<vmem>>, vector<32x128xf32>
      %cst_23 = arith.constant dense<0.000000e+00> : vector<2x128xf32>
      %22 = tpu.matmul %16, %21, %cst_23 {dimension_numbers = #tpu.dot_dimension_numbers<[1], [0], [0], [1], [0, 0, 1, 1], [], []>} : vector<2x32xf32>, vector<32x128xf32>, vector<2x128xf32> -> vector<2x128xf32>
      %c0_24 = arith.constant 0 : index
      %c0_25 = arith.constant 0 : index
      %23 = vector.load %arg4[%c0_24, %c0_25] : memref<32x128xf32, #tpu.memory_space<vmem>>, vector<32x128xf32>
      %cst_26 = arith.constant dense<0.000000e+00> : vector<2x128xf32>
      %24 = tpu.matmul %17, %23, %cst_26 {dimension_numbers = #tpu.dot_dimension_numbers<[1], [0], [0], [1], [0, 0, 1, 1], [], []>} : vector<2x32xf32>, vector<32x128xf32>, vector<2x128xf32> -> vector<2x128xf32>
      %25 = arith.addf %22, %24 : vector<2x128xf32>
      %c0_27 = arith.constant 0 : index
      %c0_28 = arith.constant 0 : index
      %26 = vector.load %arg5[%c0_27, %c0_28] : memref<32x128xf32, #tpu.memory_space<vmem>>, vector<32x128xf32>
      %cst_29 = arith.constant dense<0.000000e+00> : vector<2x128xf32>
      %27 = tpu.matmul %20, %26, %cst_29 {dimension_numbers = #tpu.dot_dimension_numbers<[1], [0], [0], [1], [0, 0, 1, 1], [], []>} : vector<2x32xf32>, vector<32x128xf32>, vector<2x128xf32> -> vector<2x128xf32>
      %28 = arith.addf %25, %27 : vector<2x128xf32>
      %c0_30 = arith.constant 0 : index
      %c0_31 = arith.constant 0 : index
      %29 = vector.load %arg6[%c0_30, %c0_31] : memref<1x128xf32, #tpu.memory_space<vmem>>, vector<1x128xf32>
      %30 = vector.broadcast %29 : vector<1x128xf32> to vector<2x128xf32>
      %31 = arith.addf %28, %30 : vector<2x128xf32>
      %cst_32 = arith.constant 0.000000e+00 : f32
      %32 = vector.broadcast %cst_32 : f32 to vector<2x128xf32>
      %33 = arith.maximumf %31, %32 : vector<2x128xf32>
      %c0_33 = arith.constant 0 : index
      %c0_34 = arith.constant 0 : index
      %34 = vector.load %arg7[%c0_33, %c0_34] : memref<128x128xf32, #tpu.memory_space<vmem>>, vector<128x128xf32>
      %cst_35 = arith.constant dense<0.000000e+00> : vector<2x128xf32>
      %35 = tpu.matmul %33, %34, %cst_35 {dimension_numbers = #tpu.dot_dimension_numbers<[1], [0], [0], [1], [0, 0, 1, 1], [], []>} : vector<2x128xf32>, vector<128x128xf32>, vector<2x128xf32> -> vector<2x128xf32>
      %c0_36 = arith.constant 0 : index
      %c0_37 = arith.constant 0 : index
      %36 = vector.load %arg8[%c0_36, %c0_37] : memref<1x128xf32, #tpu.memory_space<vmem>>, vector<1x128xf32>
      %37 = vector.broadcast %36 : vector<1x128xf32> to vector<2x128xf32>
      %38 = arith.addf %35, %37 : vector<2x128xf32>
      %c0_38 = arith.constant 0 : index
      %c0_39 = arith.constant 0 : index
      %39 = vector.load %arg9[%c0_38, %c0_39] : memref<2x128xf32, #tpu.memory_space<vmem>>, vector<2x128xf32>
      tpu.vector_store %arg9[%c0_38, %c0_39], %38 {strides = array<i32>} : memref<2x128xf32, #tpu.memory_space<vmem>>, vector<2x128xf32>,
    } else {
    }
    return
  }
  func.func @transform_0(%arg0: i32, %arg1: i32) -> (i32, i32, i32) {
    %c0_i32 = arith.constant 0 : i32
    %c0_i32_0 = arith.constant 0 : i32
    return %arg1, %arg0, %c0_i32 : i32, i32, i32
  }
  func.func @transform_1(%arg0: i32, %arg1: i32) -> (i32, i32) {
    %c0_i32 = arith.constant 0 : i32
    %c0_i32_0 = arith.constant 0 : i32
    %c0_i32_1 = arith.constant 0 : i32
    return %c0_i32, %c0_i32_0 : i32, i32
  }
  func.func @transform_2(%arg0: i32, %arg1: i32) -> (i32, i32) {
    %c0_i32 = arith.constant 0 : i32
    %c0_i32_0 = arith.constant 0 : i32
    %c0_i32_1 = arith.constant 0 : i32
    return %c0_i32, %c0_i32_0 : i32, i32
  }
  func.func @transform_3(%arg0: i32, %arg1: i32) -> (i32, i32) {
    %c0_i32 = arith.constant 0 : i32
    %c0_i32_0 = arith.constant 0 : i32
    %c0_i32_1 = arith.constant 0 : i32
    return %c0_i32, %c0_i32_0 : i32, i32
  }
  func.func @transform_4(%arg0: i32, %arg1: i32) -> (i32, i32) {
    %c0_i32 = arith.constant 0 : i32
    %c0_i32_0 = arith.constant 0 : i32
    %c0_i32_1 = arith.constant 0 : i32
    return %c0_i32, %c0_i32_0 : i32, i32
  }
  func.func @transform_5(%arg0: i32, %arg1: i32) -> (i32, i32) {
    %c0_i32 = arith.constant 0 : i32
    %c0_i32_0 = arith.constant 0 : i32
    %c0_i32_1 = arith.constant 0 : i32
    return %c0_i32, %c0_i32_0 : i32, i32
  }
  func.func @transform_6(%arg0: i32, %arg1: i32) -> (i32, i32) {
    %c0_i32 = arith.constant 0 : i32
    %c0_i32_0 = arith.constant 0 : i32
    %c0_i32_1 = arith.constant 0 : i32
    return %c0_i32, %c0_i32_0 : i32, i32
  }
  func.func @transform_7(%arg0: i32, %arg1: i32) -> (i32, i32) {
    %c0_i32 = arith.constant 0 : i32
    %c0_i32_0 = arith.constant 0 : i32
    return %arg0, %c0_i32 : i32, i32
  }
}

</mosaic_0001>

<bundles_post_ra>
// kernel: pooling_linear_classifier.1
= control target key start
LH: loop header
LB: loop body
LE: loop exit
PB: predicated region body
PF: predicated region fallthrough
CT: control target
= control target key end

     0   :  { %12 = vsyncpa [#allocation5], 0  ;;  %s1091_s0 = inlined_call_operand.hbm [shape: f32[8,2,32], index: 0, kind: input, shape index: {}]   ;;  %s1092_s1 = inlined_call_operand.hbm [shape: f32[32,128], index: 1, kind: input, shape index: {}]   ;;  %s1093_s2 = inlined_call_operand.hbm [shape: f32[32,128], index: 2, kind: input, shape index: {}]   ;;  %s1094_s3 = inlined_call_operand.hbm [shape: f32[32,128], index: 3, kind: input, shape index: {}]   ;;  %s1095_s4 = inlined_call_operand.hbm [shape: f32[1,128], index: 4, kind: input, shape index: {}]   ;;  %s1096_s5 = inlined_call_operand.hbm [shape: f32[128,128], index: 5, kind: input, shape index: {}]   ;;  %s1097_s6 = inlined_call_operand.hbm [shape: f32[1,128], index: 6, kind: input, shape index: {}]   ;;  %s1098_s7 = inlined_call_operand.hbm [shape: f32[2,128], index: 7, kind: output, shape index: {}]  }
   0x1   :  { %13 = vsyncpa [#allocation8], 0 }
   0x2   :  { %14 = vsyncpa [#allocation11], 0 }
   0x3   :  { %15 = vsyncpa [#allocation14], 0 }
   0x4   :  { %16 = vsyncpa [#allocation6], 0  ;;  %s881_s24 = smov [#allocation7]   ;;  %s695_s28 = scalar_lea.hbm %s1092_s1, 512 }
   0x5   :  { %s34_s25 = sshll.u32 %s881_s24, 4  ;;  %p696_p0 = scmp.ne.s32.totalorder %s1092_s1, %s695_s28  ;;  %s35_s25 = int_to_ptr.vmem [resolvable:$true] %s34_s25 }
   0x6   :  { %p699_p1 = scmp.lt.u32.totalorder %s695_s28, %s1092_s1 }
   0x8   :  { %p701_p2 = pnand %p699_p1, %p696_p0 }
   0xa   :  { %704 = shalt.err (!%p701_p2)
}
   0xb   :  { %s705_s10 = scalar_lea.vmem %s35_s25, 512  ;;  %p710_p4 = scmp.lt.s32.totalorder %s35_s25, %s35_s25 }
   0xc   :  { %p706_p3 = scmp.ne.s32.totalorder %s35_s25, %s705_s10  ;;  %p711_p5 = scmp.lt.s32.totalorder %s705_s10, %s705_s10 }
   0xe   :  { %p712_p6 = por %p711_p5, %p710_p4 }
  0x10   :  { %p713_p7 = pnand %p712_p6, %p706_p3 }
  0x12   :  { %716 = shalt.err (!%p713_p7)
}
  0x13   :  { %s882_s11 = smov 128   ;;  %s883_s12 = smov 8  }
  0x14   :  { %40 = dma.hbm_to_vmem [thread:$0]  %s1092_s1, 512, %s35_s25, [#allocation8], %s882_s11, %s882_s11, %s883_s12  }
  0x15   :  { %s884_s15 = smov [#allocation10]   ;;  %s885_s17 = smov [#allocation13]  }
  0x16   :  { %s58_s16 = sshll.u32 %s884_s15, 4  ;;  %s80_s18 = sshll.u32 %s885_s17, 4  ;;  %s59_s16 = int_to_ptr.vmem [resolvable:$true] %s58_s16  ;;  %s81_s18 = int_to_ptr.vmem [resolvable:$true] %s80_s18 }
  0x17   :  { %s717_s21 = scalar_lea.hbm %s1094_s3, 512 }
  0x18   :  { %p718_p8 = scmp.ne.s32.totalorder %s1094_s3, %s717_s21  ;;  %p721_p9 = scmp.lt.u32.totalorder %s717_s21, %s1094_s3 }
  0x1a   :  { %p723_p10 = pnand %p721_p9, %p718_p8 }
  0x1c   :  { %726 = shalt.err (!%p723_p10)
}
  0x1d   :  { %s727_s1 = scalar_lea.vmem %s59_s16, 512  ;;  %p732_p12 = scmp.lt.s32.totalorder %s59_s16, %s59_s16 }
  0x1e   :  { %p728_p11 = scmp.ne.s32.totalorder %s59_s16, %s727_s1  ;;  %p733_p13 = scmp.lt.s32.totalorder %s727_s1, %s727_s1 }
  0x20   :  { %p734_p0 = por %p733_p13, %p732_p12 }
  0x22   :  { %p735_p1 = pnand %p734_p0, %p728_p11 }
  0x24   :  { %738 = shalt.err (!%p735_p1)
}
  0x25   :  { %64 = dma.hbm_to_vmem [thread:$0]  %s1094_s3, 512, %s59_s16, [#allocation11], %s882_s11, %s882_s11, %s883_s12  }
  0x26   :  { %s739_s30 = scalar_lea.hbm %s1096_s5, 2048 }
  0x27   :  { %p740_p2 = scmp.ne.s32.totalorder %s1096_s5, %s739_s30  ;;  %p743_p3 = scmp.lt.u32.totalorder %s739_s30, %s1096_s5 }
  0x29   :  { %p745_p4 = pnand %p743_p3, %p740_p2 }
  0x2b   :  { %748 = shalt.err (!%p745_p4)
}
  0x2c   :  { %s749_s14 = scalar_lea.vmem %s81_s18, 2048  ;;  %p754_p6 = scmp.lt.s32.totalorder %s81_s18, %s81_s18 }
  0x2d   :  { %p750_p5 = scmp.ne.s32.totalorder %s81_s18, %s749_s14  ;;  %p755_p7 = scmp.lt.s32.totalorder %s749_s14, %s749_s14 }
  0x2f   :  { %p756_p8 = por %p755_p7, %p754_p6 }
  0x31   :  { %p757_p9 = pnand %p756_p8, %p750_p5 }
  0x33   :  { %760 = shalt.err (!%p757_p9)
}
  0x34   :  { %86 = dma.hbm_to_vmem [thread:$0]  %s1096_s5, 2048, %s81_s18, [#allocation14], %s882_s11, %s882_s11, %s883_s12  }
  0x35   :  { %s886_s16 = smov [#allocation4]   ;;  %s761_s21 = scalar_lea.hbm %s1091_s0, 256 }
  0x36   :  { %s22_s17 = sshll.u32 %s886_s16, 4  ;;  %p762_p10 = scmp.ne.s32.totalorder %s1091_s0, %s761_s21  ;;  %s23_s17 = int_to_ptr.vmem [resolvable:$true] %s22_s17 }
  0x37   :  { %p765_p11 = scmp.lt.u32.totalorder %s761_s21, %s1091_s0 }
  0x39   :  { %p767_p12 = pnand %p765_p11, %p762_p10 }
  0x3b   :  { %770 = shalt.err (!%p767_p12)
}
  0x3c   :  { %s771_s1 = scalar_lea.vmem %s23_s17, 256  ;;  %p776_p0 = scmp.lt.s32.totalorder %s23_s17, %s23_s17 }
  0x3d   :  { %p772_p13 = scmp.ne.s32.totalorder %s23_s17, %s771_s1  ;;  %p777_p1 = scmp.lt.s32.totalorder %s771_s1, %s771_s1 }
  0x3f   :  { %p778_p2 = por %p777_p1, %p776_p0 }
  0x41   :  { %p779_p3 = pnand %p778_p2, %p772_p13 }
  0x43   :  { %782 = shalt.err (!%p779_p3)
}
  0x44   :  { %s887_s5 = smov 32   ;;  %s888_s18 = smov 2  }
  0x45   :  { %28 = dma.hbm_to_vmem [thread:$0]  %s1091_s0, 256, %s23_s17, [#allocation5], %s887_s5, %s887_s5, %s888_s18  }
  0x46   :  { %s889_s28 = smov [#allocation9]   ;;  %s890_s30 = smov [#allocation12]  }
  0x47   :  { %s46_s29 = sshll.u32 %s889_s28, 4  ;;  %s71_s8 = sshll.u32 %s890_s30, 4  ;;  %s47_s29 = int_to_ptr.vmem [resolvable:$true] %s46_s29  ;;  %s72_s8 = int_to_ptr.vmem [resolvable:$true] %s71_s8 }
  0x48   :  { %s783_s13 = scalar_lea.hbm %s1093_s2, 512 }
  0x49   :  { %p784_p4 = scmp.ne.s32.totalorder %s1093_s2, %s783_s13  ;;  %p787_p5 = scmp.lt.u32.totalorder %s783_s13, %s1093_s2 }
  0x4b   :  { %p789_p6 = pnand %p787_p5, %p784_p4 }
  0x4d   :  { %792 = shalt.err (!%p789_p6)
}
  0x4e   :  { %s793_s0 = scalar_lea.vmem %s47_s29, 512  ;;  %p798_p8 = scmp.lt.s32.totalorder %s47_s29, %s47_s29 }
  0x4f   :  { %p794_p7 = scmp.ne.s32.totalorder %s47_s29, %s793_s0  ;;  %p799_p9 = scmp.lt.s32.totalorder %s793_s0, %s793_s0 }
  0x51   :  { %p800_p10 = por %p799_p9, %p798_p8 }
  0x53   :  { %p801_p11 = pnand %p800_p10, %p794_p7 }
  0x55   :  { %804 = shalt.err (!%p801_p11)
}
  0x56   :  { %52 = dma.hbm_to_vmem [thread:$0]  %s1093_s2, 512, %s47_s29, [#allocation8], %s882_s11, %s882_s11, %s883_s12  }
  0x57   :  { %s805_s22 = scalar_lea.hbm %s1095_s4, 16 }
  0x58   :  { %p806_p12 = scmp.ne.s32.totalorder %s1095_s4, %s805_s22  ;;  %p809_p13 = scmp.lt.u32.totalorder %s805_s22, %s1095_s4 }
  0x5a   :  { %p811_p0 = pnand %p809_p13, %p806_p12 }
  0x5c   :  { %814 = shalt.err (!%p811_p0)
}
  0x5d   :  { %s815_s5 = scalar_lea.vmem %s72_s8, 16  ;;  %s819_s18 = scalar_lea.vmem %s72_s8, 32 }
  0x5e   :  { %p816_p1 = scmp.ne.s32.totalorder %s72_s8, %s815_s5  ;;  %p820_p2 = scmp.lt.s32.totalorder %s72_s8, %s72_s8 }
  0x5f   :  { %p821_p3 = scmp.lt.s32.totalorder %s819_s18, %s815_s5 }
  0x61   :  { %p822_p4 = por %p821_p3, %p820_p2 }
  0x63   :  { %p823_p5 = pnand %p822_p4, %p816_p1 }
  0x65   :  { %826 = shalt.err (!%p823_p5)
}
  0x66   :  { %74 = dma.hbm_to_vmem [thread:$0]  %s1095_s4, 16, %s72_s8, [#allocation11]  }
  0x67   :  { %s891_s12 = smov [#allocation15]   ;;  %s827_s29 = scalar_lea.hbm %s1097_s6, 16 }
  0x68   :  { %s93_s25 = sshll.u32 %s891_s12, 4  ;;  %p828_p6 = scmp.ne.s32.totalorder %s1097_s6, %s827_s29  ;;  %s94_s25 = int_to_ptr.vmem [resolvable:$true] %s93_s25 }
  0x69   :  { %p831_p7 = scmp.lt.u32.totalorder %s827_s29, %s1097_s6 }
  0x6b   :  { %p833_p8 = pnand %p831_p7, %p828_p6 }
  0x6d   :  { %836 = shalt.err (!%p833_p8)
}
  0x6e   :  { %s837_s14 = scalar_lea.vmem %s94_s25, 16  ;;  %s841_s4 = scalar_lea.vmem %s94_s25, 32 }
  0x6f   :  { %p838_p9 = scmp.ne.s32.totalorder %s94_s25, %s837_s14  ;;  %p842_p10 = scmp.lt.s32.totalorder %s94_s25, %s94_s25 }
  0x70   :  { %p843_p11 = scmp.lt.s32.totalorder %s841_s4, %s837_s14 }
  0x72   :  { %p844_p12 = por %p843_p11, %p842_p10 }
  0x74   :  { %p845_p13 = pnand %p844_p12, %p838_p9 }
  0x76   :  { %848 = shalt.err (!%p845_p13)
}
  0x77   :  { %96 = dma.hbm_to_vmem [thread:$0]  %s1097_s6, 16, %s94_s25, [#allocation14]  }
  0x78   :  { %871 = dma.done.wait [#allocation5], 256  }
  0x79   :  { %872 = vsyncadd [#allocation5], 4294967040 }
  0x7a   :  { %873 = dma.done.wait [#allocation8], 1024  }
  0x7b   :  { %874 = vsyncadd [#allocation8], 4294966272 }
  0x7c   :  { %875 = dma.done.wait [#allocation11], 528  }
  0x7d   :  { %876 = vsyncadd [#allocation11], 4294966768 }
  0x7e   :  { %877 = dma.done.wait [#allocation14], 2064  }
  0x7f   :  { %878 = vsyncadd [#allocation14], 4294965232  ;;  %vm122_vm0 = vcmask 254976   ;;  %v892_v0 = vmov 0.0|0.0   ;;  %v893_v1 = vmov -inf   ;;  %v894_v2 = vmov 0.0  }
  0x80   :  { %637 = vmatprep.subr.bf16.mxu0 %v892_v0  ;;  %123 = vst.msk [vmem:[#allocation2] sm:$0x3] %vm122_vm0, %v893_v1  ;;  %124 = vst.msk [vmem:[#allocation3] sm:$0x3] %vm122_vm0, %v894_v2  ;;  %655 = vmatprep.subr.bf16.mxu1 %v892_v0  ;;  %vm895_vm1 = vmmov 0   ;;  %v182_v3 = vld [vmem:[#allocation9] sm:$0xff] }
  0x81   :  { %577 = vmatprep.mubr.msk.f32.mxu0 %vm895_vm1, %v894_v2  ;;  %634 = vmatprep.mubr.msk.f32.mxu1 %vm895_vm1, %v894_v2  ;;  %v183_v4 = vld [vmem:[#allocation9 + $0x8] sm:$0xff]  ;;  %v184_v5 = vld [vmem:[#allocation9 + $0x10] sm:$0xff]  ;;  %v185_v7 = vld [vmem:[#allocation9 + $0x18] sm:$0xff]  ;;  %vm186_vm2 = vcmask 261120   ;;  %s896_s6 = smov [#allocation16]  }
  0x82   :  { %v638_v6 = vpack.c.bf16 %v183_v4, %v182_v3  ;;  %v125_v8 = vld [vmem:[#allocation4] sm:$0x3]  ;;  %v126_v9 = vld [vmem:[#allocation4 + $0x2] sm:$0x3]  ;;  %v127_v10 = vld [vmem:[#allocation4 + $0x4] sm:$0x3]  ;;  %v641_v13 = vpack.c.bf16 %v185_v7, %v184_v5 }
  0x83   :  { %v128_v11 = vld [vmem:[#allocation4 + $0x6] sm:$0x3]  ;;  %v129_v12 = vld [vmem:[#allocation4 + $0x8] sm:$0x3]  ;;  %v130_v14 = vld [vmem:[#allocation4 + $0xa] sm:$0x3] }
  0x84   :  { %639 = vmatpush3.bf16.msra.mxu0 %v638_v6  ;;  %v131_v15 = vld [vmem:[#allocation4 + $0xc] sm:$0x3]  ;;  %v132_v16 = vld [vmem:[#allocation4 + $0xe] sm:$0x3]  ;;  %v135_v17 = vsel %vm122_vm0, %v125_v8, -inf  ;;  %v136_v18 = vsel %vm122_vm0, %v126_v9, -inf }
  0x85   :  { %640 = vmatprep.subr.bf16.mxu0 %v892_v0  ;;  %v137_v19 = vsel %vm122_vm0, %v127_v10, -inf  ;;  %v138_v20 = vsel %vm122_vm0, %v128_v11, -inf  ;;  %v139_v21 = vsel %vm122_vm0, %v129_v12, -inf  ;;  %v141_v22 = vsel %vm122_vm0, %v130_v14, -inf  ;;  %v420_v37 = vld [vmem:[#allocation13] sm:$0xff]  ;;  %v421_v38 = vld [vmem:[#allocation13 + $0x8] sm:$0xff] }
  0x86   :  { %v143_v23 = vsel %vm122_vm0, %v131_v15, -inf  ;;  %v145_v24 = vsel %vm122_vm0, %v132_v16, -inf  ;;  %v140_v25 = vmax.f32 %v135_v17, %v139_v21  ;;  %v142_v26 = vmax.f32 %v136_v18, %v141_v22  ;;  %v422_v41 = vld [vmem:[#allocation13 + $0x10] sm:$0xff]  ;;  %v423_v42 = vld [vmem:[#allocation13 + $0x18] sm:$0xff]  ;;  %v424_v50 = vld [vmem:[#allocation13 + $0x20] sm:$0xff]  ;;  %s520_s15 = sshll.u32 %s896_s6, 4  ;;  %s521_s15 = int_to_ptr.vmem [resolvable:$true] %s520_s15 }
  0x87   :  { %v144_v27 = vmax.f32 %v137_v19, %v143_v23  ;;  %v146_v28 = vmax.f32 %v138_v20, %v145_v24  ;;  %v153_v29 = vsel %vm122_vm0, %v125_v8, 0.0  ;;  %v154_v30 = vsel %vm122_vm0, %v126_v9, 0.0  ;;  %v133_v35 = vld [vmem:[#allocation2] sm:$0x3]  ;;  %v178_v54 = vld [vmem:[#allocation7] sm:$0xff]  ;;  %v180_v62 = vld [vmem:[#allocation7 + $0x10] sm:$0xff]  ;;  %p854_p1 = scmp.lt.s32.totalorder %s521_s15, %s521_s15 }
  0x88   :  { %642 = vmatpush3.bf16.msra.mxu0 %v641_v13  ;;  %v156_v31 = vsel %vm122_vm0, %v127_v10, 0.0  ;;  %v147_v32 = vmax.f32 %v140_v25, %v142_v26  ;;  %v155_v34 = vadd.f32 %v154_v30, %v153_v29  ;;  %v158_v36 = vsel %vm122_vm0, %v128_v11, 0.0  ;;  %v425_v51 = vld [vmem:[#allocation13 + $0x28] sm:$0xff]  ;;  %v181_v63 = vld [vmem:[#allocation7 + $0x18] sm:$0xff]  ;;  %v333_v5 = vld [vmem:[#allocation10] sm:$0xff]  ;;  %s849_s16 = scalar_lea.vmem %s521_s15, 32 }
  0x89   :  { %v148_v33 = vmax.f32 %v144_v27, %v146_v28  ;;  %643 = vmatprep.subr.bf16.mxu0 %v892_v0  ;;  %v160_v43 = vsel %vm122_vm0, %v129_v12, 0.0  ;;  %v656_v44 = vpack.c.bf16 %v421_v38, %v420_v37  ;;  %v162_v47 = vsel %vm122_vm0, %v130_v14, 0.0  ;;  %v179_v55 = vld [vmem:[#allocation7 + $0x8] sm:$0xff]  ;;  %v174_v7 = vld [vmem:[#allocation4 + $0xe] sm:$0x3]  ;;  %v335_v9 = vld [vmem:[#allocation10 + $0x10] sm:$0xff]  ;;  %p850_p0 = scmp.ne.s32.totalorder %s521_s15, %s849_s16  ;;  %p855_p2 = scmp.lt.s32.totalorder %s849_s16, %s849_s16 }
  0x8a   :  { %v157_v40 = vadd.f32 %v156_v31, %v155_v34  ;;  %v659_v48 = vpack.c.bf16 %v423_v42, %v422_v41  ;;  %v164_v52 = vsel %vm122_vm0, %v131_v15, 0.0  ;;  %v166_v56 = vsel %vm122_vm0, %v132_v16, 0.0  ;;  %v152_v59 = vld [vmem:[#allocation3] sm:$0x3]  ;;  %v336_v10 = vld [vmem:[#allocation10 + $0x18] sm:$0xff]  ;;  %v428_v17 = vld [vmem:[#allocation13 + $0x40] sm:$0xff] }
  0x8b   :  { %v149_v39 = vmax.f32 %v147_v32, %v148_v33  ;;  %657 = vmatpush3.bf16.msra.mxu1 %v656_v44  ;;  %v662_v57 = vpack.c.bf16 %v425_v51, %v424_v50  ;;  %v644_v60 = vpack.c.bf16 %v179_v55, %v178_v54  ;;  %v647_v4 = vpack.c.bf16 %v181_v63, %v180_v62  ;;  %v334_v6 = vld [vmem:[#allocation10 + $0x8] sm:$0xff]  ;;  %v426_v14 = vld [vmem:[#allocation13 + $0x30] sm:$0xff]  ;;  %v427_v15 = vld [vmem:[#allocation13 + $0x38] sm:$0xff]  ;;  %p856_p3 = por %p855_p2, %p854_p1 }
  0x8c   :  { %v159_v46 = vadd.f32 %v158_v36, %v157_v40  ;;  %658 = vmatprep.subr.bf16.mxu1 %v892_v0  ;;  %v650_v8 = vpack.c.bf16 %v334_v6, %v333_v5  ;;  %v653_v11 = vpack.c.bf16 %v336_v10, %v335_v9  ;;  %v665_v16 = vpack.c.bf16 %v427_v15, %v426_v14  ;;  %v429_v18 = vld [vmem:[#allocation13 + $0x48] sm:$0xff]  ;;  %v431_v20 = vld [vmem:[#allocation13 + $0x58] sm:$0xff]  ;;  %v432_v22 = vld [vmem:[#allocation13 + $0x60] sm:$0xff] }
  0x8d   :  { %v150_v45 = vmax.f32 %v133_v35, %v149_v39  ;;  %v668_v19 = vpack.c.bf16 %v429_v18, %v428_v17  ;;  %v433_v23 = vld [vmem:[#allocation13 + $0x68] sm:$0xff]  ;;  %v434_v25 = vld [vmem:[#allocation13 + $0x70] sm:$0xff]  ;;  %v435_v26 = vld [vmem:[#allocation13 + $0x78] sm:$0xff]  ;;  %p857_p4 = pnand %p856_p3, %p850_p0 }
  0x8e   :  { %v161_v49 = vadd.f32 %v160_v43, %v159_v46  ;;  %v674_v24 = vpack.c.bf16 %v433_v23, %v432_v22  ;;  %v677_v27 = vpack.c.bf16 %v435_v26, %v434_v25  ;;  %v535_v34 = vld [vmem:[#allocation12] ss:$0 sm:$0xff]  ;;  %v536_v39 = vld [vmem:[#allocation15] ss:$0 sm:$0xff] }
  0x8f   :  { %151 = vst.msk [vmem:[#allocation2] sm:$0x3] %vm122_vm0, %v150_v45  ;;  %660 = vmatpush3.bf16.msra.mxu1 %v659_v48 }
  0x90   :  { %v163_v53 = vadd.f32 %v162_v47, %v161_v49  ;;  %661 = vmatprep.subr.bf16.mxu1 %v892_v0 }
  0x92   :  { %v165_v58 = vadd.f32 %v164_v52, %v163_v53 }
  0x93   :  { %663 = vmatpush3.bf16.msra.mxu1 %v662_v57 }
  0x94   :  { %v167_v61 = vadd.f32 %v166_v56, %v165_v58  ;;  %664 = vmatprep.subr.bf16.mxu1 %v892_v0 }
  0x96   :  { %v175_v1 = vld [vmem:[#allocation2] sm:$0x3]  ;;  %v168_v3 = vadd.f32 %v167_v61, %v152_v59 }
  0x97   :  { %578 = vmatmul.mubr.msk.f32.vlgmr.msra.gmra.mrb[0].mxu0 %vm186_vm2, %v175_v1  ;;  %666 = vmatpush3.bf16.msra.mxu1 %v665_v16 }
  0x98   :  { %645 = vmatpush3.bf16.msra.mxu0 %v644_v60  ;;  %588 = vmatprep.mubr.msk.f32.mxu0 %vm895_vm1, %v894_v2  ;;  %169 = vst.msk [vmem:[#allocation3] sm:$0x3] %vm122_vm0, %v168_v3 }
  0x99   :  { %646 = vmatprep.subr.bf16.mxu0 %v892_v0  ;;  %667 = vmatprep.subr.bf16.mxu1 %v892_v0 }
  0x9b   :  { %669 = vmatpush3.bf16.msra.mxu1 %v668_v19 }
  0x9c   :  { %648 = vmatpush3.bf16.msra.mxu0 %v647_v4  ;;  %670 = vmatprep.subr.bf16.mxu1 %v892_v0 }
  0x9d   :  { %649 = vmatprep.subr.bf16.mxu0 %v892_v0 }
  0x9f   :  { %589 = vmatmul.mubr.msk.f32.vlgmr.msra.gmra.mrb[2].mxu0 %vm186_vm2, %v174_v7  ;;  %v176_v12 = vld [vmem:[#allocation3] sm:$0x3] }
  0xa0   :  { %651 = vmatpush3.bf16.msra.mxu0 %v650_v8  ;;  %599 = vmatprep.mubr.msk.f32.mxu0 %vm895_vm1, %v894_v2  ;;  %v177_v13 = vmul.f32 0.125, %v176_v12  ;;  %v430_v2 = vld [vmem:[#allocation13 + $0x50] sm:$0xff] }
  0xa1   :  { %652 = vmatprep.subr.bf16.mxu0 %v892_v0  ;;  %v671_v21 = vpack.c.bf16 %v431_v20, %v430_v2 }
  0xa3   :  { %672 = vmatpush3.bf16.msra.mxu1 %v671_v21 }
  0xa4   :  { %654 = vmatpush3.bf16.msra.mxu0 %v653_v11  ;;  %673 = vmatprep.subr.bf16.mxu1 %v892_v0 }
  0xa7   :  { %600 = vmatmul.mubr.msk.f32.vlgmr.msra.gmra.mrb[4].mxu0 %vm186_vm2, %v177_v13  ;;  %675 = vmatpush3.bf16.msra.mxu1 %v674_v24 }
  0xa8   :  { %676 = vmatprep.subr.bf16.mxu1 %v892_v0 }
  0xab   :  { %678 = vmatpush3.bf16.msra.mxu1 %v677_v27 }
 0x16a   :  { %v256_v28 = vpop.f32.mrb[0].mxu0 }
 0x16b   :  { %v579_v29 = vpop.f32.mrb[1].mxu0 }
 0x172   :  { %v329_v30 = vpop.f32.mrb[2].mxu0 }
 0x173   :  { %v330_v31 = vadd.f32 %v329_v30, %v256_v28  ;;  %v590_v32 = vpop.f32.mrb[3].mxu0 }
 0x17a   :  { %v406_v33 = vpop.f32.mrb[4].mxu0 }
 0x17b   :  { %v410_v35 = vadd.f32 %v406_v33, %v330_v31  ;;  %v601_v36 = vpop.f32.mrb[5].mxu0 }
 0x17d   :  { %v418_v37 = vadd.f32 %v535_v34, %v410_v35 }
 0x17f   :  { %v419_v38 = vmax.f32 %v418_v37, 0.0 }
 0x181   :  { %635 = vmatmul.mubr.f32.vlgmr.msra.gmra.mrb[0].mxu1 %v419_v38 }
 0x254   :  { %v509_v0 = vpop.f32.mrb[0].mxu1 }
 0x255   :  { %v510_v40 = vadd.f32 %v536_v39, %v509_v0  ;;  %v636_v41 = vpop.f32.mrb[1].mxu1 }
 0x257   :  { %513 = vst [vmem:[#allocation16] sm:$0x3] %v510_v40 }
 0x258   :  { %860 = shalt.err (!%p857_p4)
}
 0x259   :  { %s861_s19 = scalar_lea.hbm %s1098_s7, 32 }
 0x25a   :  { %p862_p5 = scmp.ne.s32.totalorder %s1098_s7, %s861_s19  ;;  %p865_p6 = scmp.lt.u32.totalorder %s861_s19, %s1098_s7 }
 0x25c   :  { %p867_p7 = pnand %p865_p6, %p862_p5 }
 0x25e   :  { %870 = shalt.err (!%p867_p7)
}
 0x25f   :  { %523 = dma.vmem_to_hbm [thread:$0]  %s521_s15, 32, %s1098_s7, [#allocation6]  }
 0x260   :  { %879 = dma.done.wait [#allocation6], 32  }
 0x261   :  { %880 = vsyncadd [#allocation6], 4294967264 }
 0x262   :  { %527 = vsyncpa [#allocation5], 1 }
 0x263   :  { %528 = vsyncpa [#allocation8], 1 }
 0x264   :  { %529 = vsyncpa [#allocation11], 1 }
 0x265   :  { %530 = vsyncpa [#allocation14], 1 }
 0x266   :  { %531 = vsyncpa [#allocation6], 1 }

</bundles_post_ra>
